<compile_context>
chip_gen: v7x
topology: tpu7x:2x2x1
jax: 0.10.0
libtpu: 0.0.40
codegen_flags: <defaults>
</compile_context>

<pallas_src>
import functools

import jax
import jax.numpy as jnp
from jax.experimental import pallas as pl
from jax.experimental.pallas import tpu as pltpu

LANES = 128    # TPU lane width; output / weight columns padded to this.
HIDDEN = 16    # hidden width of the PyTorch module.


def _round_up(x, m):
    return ((x + m - 1) // m) * m


# ---------------------------------------------------------------------------
# Kernel
# ---------------------------------------------------------------------------
def _a3c_kernel(x_ref, w_ref, b_ref, out_ref, *, n_output):
    # Static segment offsets (all multiples of 16 -> bf16-tile aligned slices).
    k_in = w_ref.shape[0] - 2 * HIDDEN

    x = x_ref[...]                                    # (tile_b, k_in)  bf16
    w_in = w_ref[0:k_in, :]                           # (k_in, 128)     bf16
    w_fc = w_ref[k_in:k_in + HIDDEN, :]               # (16, 128)       bf16
    w_hd = w_ref[k_in + HIDDEN:k_in + 2 * HIDDEN, :]  # col0=value, 1..=policy
    b_in = b_ref[0:1, :]                              # (1, 128)        f32
    b_fc = b_ref[1:2, :]
    b_hd = b_ref[2:3, :]

    # Layer 1: (tile_b, k_in) @ (k_in, 128) -> f32, bias + ReLU in f32.
    h = jnp.maximum(
        jnp.dot(x, w_in, preferred_element_type=jnp.float32) + b_in, 0.0)
    # Layer 2: slice h to its 16 real lanes, K=16 MXU pass.
    h = jnp.maximum(
        jnp.dot(h[:, :HIDDEN].astype(jnp.bfloat16), w_fc,
                preferred_element_type=jnp.float32) + b_fc, 0.0)
    # Fused value+policy head: one MXU pass, f32 logits.
    z = jnp.dot(h[:, :HIDDEN].astype(jnp.bfloat16), w_hd,
                preferred_element_type=jnp.float32) + b_hd   # (tile_b, 128)

    lane = jax.lax.broadcasted_iota(jnp.int32, z.shape, 1)
    is_pol = jnp.logical_and(lane >= 1, lane < 1 + n_output)

    # Masked softmax over policy columns (value / padding lanes excluded).
    logits = jnp.where(is_pol, z, jnp.float32(-1e30))
    m = jnp.max(logits, axis=-1, keepdims=True)
    e = jnp.exp(logits - m)            # masked lanes underflow to exactly 0
    s = jnp.sum(e, axis=-1, keepdims=True)
    probs = e / s                      # exact; EUP/VPU have slack here

    # col 0 = raw value, policy cols = probs, padding cols = 0 -> one dense store.
    out_ref[...] = jnp.where(lane == 0, z, probs).astype(out_ref.dtype)


# ---------------------------------------------------------------------------
# Host-side packing & wrapper
# ---------------------------------------------------------------------------
def pack_params(params, n_input, n_output, hidden=HIDDEN):
    """Pack weights into a bf16 (k_in + 2*hidden, 128) slab + f32 (8,128) bias slab."""
    (w_in, b_in, w_fc, b_fc, w_v, b_v, w_p, b_p) = params
    assert n_output >= 1 and (1 + n_output) <= LANES and hidden <= LANES
    k_in = _round_up(max(n_input, 1), 16)     # 16-aligned segment offsets (bf16)

    w = jnp.zeros((k_in + 2 * hidden, LANES), jnp.float32)
    w = w.at[0:n_input, 0:hidden].set(w_in)
    w = w.at[k_in:k_in + hidden, 0:hidden].set(w_fc)
    w = w.at[k_in + hidden:k_in + 2 * hidden, 0:1].set(w_v)
    w = w.at[k_in + hidden:k_in + 2 * hidden, 1:1 + n_output].set(w_p)
    w = w.astype(jnp.bfloat16)

    b = jnp.zeros((8, LANES), jnp.float32)    # biases stay f32 (v5e VPU path)
    b = b.at[0, 0:hidden].set(b_in.reshape(-1))
    b = b.at[1, 0:hidden].set(b_fc.reshape(-1))
    b = b.at[2, 0:1].set(b_v.reshape(-1))
    b = b.at[2, 1:1 + n_output].set(b_p.reshape(-1))
    return w, b


def a3c_forward(x, w_slab, b_slab, n_output, *, tile_b=None):
    assert n_output >= 1
    batch, n_input = x.shape
    k_in = w_slab.shape[0] - 2 * HIDDEN
    assert n_input <= k_in

    # Batch tile: multiple of 16 (bf16 sublane packing).  batch >= 256 gets
    # >= 2 grid steps (v7x has 2 TCs); tiles capped at 256 rows (v6e MXU M-dim).
    if tile_b is None:
        if batch < 256:
            tile_b = _round_up(batch, 16)
        else:
            tile_b = min(256, _round_up((batch + 1) // 2, 16))
    tile_b = max(16, _round_up(tile_b, 16))
    batch_pad = _round_up(batch, tile_b)

    # Pad x only to k_in lanes (not 128) in bf16; zero rows/lanes are harmless.
    x_p = jnp.zeros((batch_pad, k_in), jnp.bfloat16)
    x_p = x_p.at[:batch, :n_input].set(x.astype(jnp.bfloat16))

    n_w = w_slab.shape[0]
    grid = (batch_pad // tile_b,)

    cost = pl.CostEstimate(
        flops=2 * batch_pad * LANES * (k_in + 2 * HIDDEN),
        transcendentals=batch_pad * LANES,
        bytes_accessed=(x_p.size * 2 + w_slab.size * 2 + b_slab.size * 4
                        + batch_pad * LANES * 4),
    )

    out = pl.pallas_call(
        functools.partial(_a3c_kernel, n_output=n_output),
        out_shape=jax.ShapeDtypeStruct((batch_pad, LANES), jnp.float32),
        grid=grid,
        in_specs=[
            pl.BlockSpec((tile_b, k_in), lambda i: (i, 0)),   # x tile (bf16)
            pl.BlockSpec((n_w, LANES), lambda i: (0, 0)),     # weight slab (resident)
            pl.BlockSpec((8, LANES), lambda i: (0, 0)),       # bias slab (resident)
        ],
        out_specs=pl.BlockSpec((tile_b, LANES), lambda i: (i, 0)),
        compiler_params=pltpu.CompilerParams(
            dimension_semantics=("parallel",)),               # shards across v7x TCs
        cost_estimate=cost,
    )(x_p, w_slab, b_slab)

    value = out[:batch, 0:1]
    policy = out[:batch, 1:1 + n_output]
    return value, policy


# ---------------------------------------------------------------------------
# Params / reference
# ---------------------------------------------------------------------------
def init_params(key, n_input, n_output, hidden=HIDDEN):
    """Deterministic synthetic init (shapes match the PyTorch module)."""
    ks = jax.random.split(key, 8)

    def lin(kw, kb, fan_in, fan_out):
        bound = 1.0 / jnp.sqrt(fan_in)
        w = jax.random.uniform(kw, (fan_in, fan_out), jnp.float32, -bound, bound)
        b = jax.random.uniform(kb, (1, fan_out), jnp.float32, -bound, bound)
        return w, b

    w_in, b_in = lin(ks[0], ks[1], n_input, hidden)
    w_fc, b_fc = lin(ks[2], ks[3], hidden, hidden)
    w_v, b_v = lin(ks[4], ks[5], hidden, 1)
    w_p, b_p = lin(ks[6], ks[7], hidden, n_output)
    return (w_in, b_in, w_fc, b_fc, w_v, b_v, w_p, b_p)


def reference_forward(x, params, *, mirror_bf16=False):
    """Pure-JAX reference.  mirror_bf16=True reproduces the kernel's bf16
    operand casts (f32 accumulation) so it can be compared tightly."""
    (w_in, b_in, w_fc, b_fc, w_v, b_v, w_p, b_p) = params

    def mm(a, b):
        if mirror_bf16:
            a = a.astype(jnp.bfloat16)
            b = b.astype(jnp.bfloat16)
        return jnp.dot(a, b, preferred_element_type=jnp.float32)

    h = jnp.maximum(mm(x, w_in) + b_in, 0.0)
    h = jnp.maximum(mm(h, w_fc) + b_fc, 0.0)
    value = mm(h, w_v) + b_v
    policy = jax.nn.softmax(mm(h, w_p) + b_p, axis=-1)
    return value, policy


if __name__ == "__main__":
    key = jax.random.PRNGKey(0)
    k_x, k_p = jax.random.split(key)

    batch, n_input, n_output = 8, 4, 6
    x = jax.random.normal(k_x, (batch, n_input), jnp.float32)
    params = init_params(k_p, n_input, n_output)
    w_slab, b_slab = pack_params(params, n_input, n_output)

    value, policy = a3c_forward(x, w_slab, b_slab, n_output)
    jax.block_until_ready((value, policy))

    assert value.shape == (batch, 1) and policy.shape == (batch, n_output)

    # Tight check vs. a reference that mirrors the kernel's bf16 operand casts.
    v_bf, p_bf = reference_forward(x, params, mirror_bf16=True)
    assert jnp.allclose(value, v_bf, atol=1e-4, rtol=1e-4)
    assert jnp.allclose(policy, p_bf, atol=1e-4, rtol=1e-4)

    # Policy rows are exactly normalized (exact reciprocal in-kernel).
    assert jnp.allclose(jnp.sum(policy, axis=-1), 1.0, atol=1e-5)

    # Loose check vs. the pure-f32 module semantics (bf16 quantization only).
    v_f32, p_f32 = reference_forward(x, params, mirror_bf16=False)
    assert jnp.allclose(value, v_f32, atol=1e-1)
    assert jnp.allclose(policy, p_f32, atol=1e-1)

    print("KERNEL_OK")
</pallas_src>

<mosaic_0001>
module attributes {stable_mosaic.version = 11 : i64} {
  func.func @_a3c_kernel(%arg0: i32, %arg1: memref<16x16xbf16, #tpu.memory_space<vmem>>, %arg2: memref<48x128xbf16, #tpu.memory_space<vmem>>, %arg3: memref<8x128xf32, #tpu.memory_space<vmem>>, %arg4: memref<16x128xf32, #tpu.memory_space<vmem>>) attributes {dimension_semantics = [#tpu.dimension_semantics<parallel>], iteration_bounds = array<i64: 1>, scalar_prefetch = 0 : i64, scratch_operands = 0 : i64, tpu.core_type = #tpu.core_type<tc>, window_params = [{transform_indices = @transform_0, window_bounds = array<i64: 16, 16>}, {pipeline_mode = #tpu.pipeline_mode<synchronous>, transform_indices = @transform_1, window_bounds = array<i64: 48, 128>}, {pipeline_mode = #tpu.pipeline_mode<synchronous>, transform_indices = @transform_2, window_bounds = array<i64: 8, 128>}, {transform_indices = @transform_3, window_bounds = array<i64: 16, 128>}]} {
    %c0 = arith.constant 0 : index
    %c0_0 = arith.constant 0 : index
    %0 = vector.load %arg1[%c0, %c0_0] : memref<16x16xbf16, #tpu.memory_space<vmem>>, vector<16x16xbf16>
    %c0_1 = arith.constant 0 : index
    %c0_2 = arith.constant 0 : index
    %1 = vector.load %arg2[%c0_1, %c0_2] : memref<48x128xbf16, #tpu.memory_space<vmem>>, vector<16x128xbf16>
    %c16 = arith.constant 16 : index
    %c0_3 = arith.constant 0 : index
    %2 = vector.load %arg2[%c16, %c0_3] : memref<48x128xbf16, #tpu.memory_space<vmem>>, vector<16x128xbf16>
    %c32 = arith.constant 32 : index
    %c0_4 = arith.constant 0 : index
    %3 = vector.load %arg2[%c32, %c0_4] : memref<48x128xbf16, #tpu.memory_space<vmem>>, vector<16x128xbf16>
    %c0_5 = arith.constant 0 : index
    %c0_6 = arith.constant 0 : index
    %4 = vector.load %arg3[%c0_5, %c0_6] : memref<8x128xf32, #tpu.memory_space<vmem>>, vector<1x128xf32>
    %c1 = arith.constant 1 : index
    %c0_7 = arith.constant 0 : index
    %5 = vector.load %arg3[%c1, %c0_7] : memref<8x128xf32, #tpu.memory_space<vmem>>, vector<1x128xf32>
    %c2 = arith.constant 2 : index
    %c0_8 = arith.constant 0 : index
    %6 = vector.load %arg3[%c2, %c0_8] : memref<8x128xf32, #tpu.memory_space<vmem>>, vector<1x128xf32>
    %cst = arith.constant dense<0.000000e+00> : vector<16x128xf32>
    %7 = tpu.matmul %0, %1, %cst {dimension_numbers = #tpu.dot_dimension_numbers<[1], [0], [0], [1], [0, 0, 1, 1], [], []>} : vector<16x16xbf16>, vector<16x128xbf16>, vector<16x128xf32> -> vector<16x128xf32>
    %8 = vector.broadcast %4 : vector<1x128xf32> to vector<16x128xf32>
    %9 = arith.addf %7, %8 : vector<16x128xf32>
    %cst_9 = arith.constant 0.000000e+00 : f32
    %10 = vector.broadcast %cst_9 : f32 to vector<16x128xf32>
    %11 = arith.maximumf %9, %10 : vector<16x128xf32>
    %12 = vector.extract_strided_slice %11 {offsets = [0, 0], sizes = [16, 16], strides = [1, 1]} : vector<16x128xf32> to vector<16x16xf32>
    %13 = arith.truncf %12 : vector<16x16xf32> to vector<16x16xbf16>
    %cst_10 = arith.constant dense<0.000000e+00> : vector<16x128xf32>
    %14 = tpu.matmul %13, %2, %cst_10 {dimension_numbers = #tpu.dot_dimension_numbers<[1], [0], [0], [1], [0, 0, 1, 1], [], []>} : vector<16x16xbf16>, vector<16x128xbf16>, vector<16x128xf32> -> vector<16x128xf32>
    %15 = vector.broadcast %5 : vector<1x128xf32> to vector<16x128xf32>
    %16 = arith.addf %14, %15 : vector<16x128xf32>
    %cst_11 = arith.constant 0.000000e+00 : f32
    %17 = vector.broadcast %cst_11 : f32 to vector<16x128xf32>
    %18 = arith.maximumf %16, %17 : vector<16x128xf32>
    %19 = vector.extract_strided_slice %18 {offsets = [0, 0], sizes = [16, 16], strides = [1, 1]} : vector<16x128xf32> to vector<16x16xf32>
    %20 = arith.truncf %19 : vector<16x16xf32> to vector<16x16xbf16>
    %cst_12 = arith.constant dense<0.000000e+00> : vector<16x128xf32>
    %21 = tpu.matmul %20, %3, %cst_12 {dimension_numbers = #tpu.dot_dimension_numbers<[1], [0], [0], [1], [0, 0, 1, 1], [], []>} : vector<16x16xbf16>, vector<16x128xbf16>, vector<16x128xf32> -> vector<16x128xf32>
    %22 = vector.broadcast %6 : vector<1x128xf32> to vector<16x128xf32>
    %23 = arith.addf %21, %22 : vector<16x128xf32>
    %24 = tpu.iota {dimensions = array<i32: 1>} : vector<16x128xi32>
    %c1_i32 = arith.constant 1 : i32
    %25 = vector.broadcast %c1_i32 : i32 to vector<16x128xi32>
    %26 = arith.cmpi sge, %24, %25 : vector<16x128xi32>
    %c7_i32 = arith.constant 7 : i32
    %27 = vector.broadcast %c7_i32 : i32 to vector<16x128xi32>
    %28 = arith.cmpi slt, %24, %27 : vector<16x128xi32>
    %29 = arith.andi %26, %28 : vector<16x128xi1>
    %cst_13 = arith.constant -1.000000e+30 : f32
    %30 = vector.broadcast %cst_13 : f32 to vector<16x128xf32>
    %31 = arith.select %29, %23, %30 : vector<16x128xi1>, vector<16x128xf32>
    %cst_14 = arith.constant dense<0xFF800000> : vector<16xf32>
    %32 = vector.multi_reduction <maximumf>, %31, %cst_14 [1] : vector<16x128xf32> to vector<16xf32>
    %33 = vector.shape_cast %32 : vector<16xf32> to vector<16x1xf32>
    %34 = vector.broadcast %33 : vector<16x1xf32> to vector<16x128xf32>
    %35 = arith.subf %31, %34 : vector<16x128xf32>
    %36 = math.exp %35 : vector<16x128xf32>
    %cst_15 = arith.constant dense<0.000000e+00> : vector<16xf32>
    %37 = vector.multi_reduction <add>, %36, %cst_15 [1] : vector<16x128xf32> to vector<16xf32>
    %38 = vector.shape_cast %37 : vector<16xf32> to vector<16x1xf32>
    %39 = vector.broadcast %38 : vector<16x1xf32> to vector<16x128xf32>
    %40 = arith.divf %36, %39 : vector<16x128xf32>
    %c0_i32 = arith.constant 0 : i32
    %41 = vector.broadcast %c0_i32 : i32 to vector<16x128xi32>
    %42 = arith.cmpi eq, %24, %41 : vector<16x128xi32>
    %43 = arith.select %42, %23, %40 : vector<16x128xi1>, vector<16x128xf32>
    %c0_16 = arith.constant 0 : index
    %c0_17 = arith.constant 0 : index
    %44 = vector.load %arg4[%c0_16, %c0_17] : memref<16x128xf32, #tpu.memory_space<vmem>>, vector<16x128xf32>
    tpu.vector_store %arg4[%c0_16, %c0_17], %43 {strides = array<i32>} : memref<16x128xf32, #tpu.memory_space<vmem>>, vector<16x128xf32>,
    return
  }
  func.func @transform_0(%arg0: i32) -> (i32, i32) {
    %c0_i32 = arith.constant 0 : i32
    %c0_i32_0 = arith.constant 0 : i32
    return %arg0, %c0_i32 : i32, i32
  }
  func.func @transform_1(%arg0: i32) -> (i32, i32) {
    %c0_i32 = arith.constant 0 : i32
    %c0_i32_0 = arith.constant 0 : i32
    %c0_i32_1 = arith.constant 0 : i32
    return %c0_i32, %c0_i32_0 : i32, i32
  }
  func.func @transform_2(%arg0: i32) -> (i32, i32) {
    %c0_i32 = arith.constant 0 : i32
    %c0_i32_0 = arith.constant 0 : i32
    %c0_i32_1 = arith.constant 0 : i32
    return %c0_i32, %c0_i32_0 : i32, i32
  }
  func.func @transform_3(%arg0: i32) -> (i32, i32) {
    %c0_i32 = arith.constant 0 : i32
    %c0_i32_0 = arith.constant 0 : i32
    return %arg0, %c0_i32 : i32, i32
  }
}

</mosaic_0001>

<bundles_post_ra>
// kernel: tpu_custom_call.1
= control target key start
LH: loop header
LB: loop body
LE: loop exit
PB: predicated region body
PF: predicated region fallthrough
CT: control target
= control target key end

     0   :  { %8 = vsyncpa [#allocation3], 0  ;;  %s526_s0 = inlined_call_operand.hbm [shape: bf16[16,16], index: 0, kind: input, shape index: {}]   ;;  %s527_s1 = inlined_call_operand.hbm [shape: bf16[48,128], index: 1, kind: input, shape index: {}]   ;;  %s528_s2 = inlined_call_operand.hbm [shape: f32[8,128], index: 2, kind: input, shape index: {}]   ;;  %s529_s3 = inlined_call_operand.hbm [shape: f32[16,128], index: 3, kind: output, shape index: {}]  }
   0x1   :  { %9 = vsyncpa [#allocation6], 0 }
   0x2   :  { %10 = vsyncpa [#allocation4], 0  ;;  %s438_s12 = smov [#allocation5]   ;;  %s439_s14 = smov [#allocation2]  }
   0x3   :  { %s28_s13 = sshll.u32 %s438_s12, 4  ;;  %s16_s15 = sshll.u32 %s439_s14, 4  ;;  %s29_s13 = int_to_ptr.vmem [resolvable:$true] %s28_s13  ;;  %s468_s15 = int_to_ptr.vmem [resolvable:$true] %s16_s15 }
   0x4   :  { %s344_s18 = scalar_lea.hbm %s527_s1, 384 }
   0x5   :  { %p345_p0 = scmp.ne.s32.totalorder %s527_s1, %s344_s18  ;;  %p348_p1 = scmp.lt.u32.totalorder %s344_s18, %s527_s1 }
   0x7   :  { %p350_p2 = pnand %p348_p1, %p345_p0 }
   0x9   :  { %353 = shalt.err (!%p350_p2)
}
   0xa   :  { %s354_s23 = scalar_lea.vmem %s29_s13, 384  ;;  %p359_p4 = scmp.lt.s32.totalorder %s29_s13, %s29_s13 }
   0xb   :  { %p355_p3 = scmp.ne.s32.totalorder %s29_s13, %s354_s23  ;;  %p360_p5 = scmp.lt.s32.totalorder %s354_s23, %s354_s23 }
   0xd   :  { %p361_p6 = por %p360_p5, %p359_p4 }
   0xf   :  { %p362_p7 = pnand %p361_p6, %p355_p3 }
  0x11   :  { %365 = shalt.err (!%p362_p7)
}
  0x12   :  { %s440_s24 = smov 64   ;;  %s441_s25 = smov 4  }
  0x13   :  { %34 = dma.hbm_to_vmem [thread:$0]  %s527_s1, 384, %s29_s13, [#allocation6], %s440_s24, %s440_s24, %s441_s25  }
  0x14   :  { %s366_s30 = scalar_lea.hbm %s526_s0, 128 }
  0x15   :  { %p367_p8 = scmp.ne.s32.totalorder %s526_s0, %s366_s30  ;;  %p370_p9 = scmp.lt.u32.totalorder %s366_s30, %s526_s0 }
  0x17   :  { %p372_p10 = pnand %p370_p9, %p367_p8 }
  0x19   :  { %375 = shalt.err (!%p372_p10)
}
  0x1a   :  { %s376_s8 = scalar_lea.vmem %s468_s15, 128  ;;  %p381_p12 = scmp.lt.s32.totalorder %s468_s15, %s468_s15 }
  0x1b   :  { %p377_p11 = scmp.ne.s32.totalorder %s468_s15, %s376_s8  ;;  %p382_p13 = scmp.lt.s32.totalorder %s376_s8, %s376_s8 }
  0x1d   :  { %p383_p0 = por %p382_p13, %p381_p12 }
  0x1f   :  { %p384_p1 = pnand %p383_p0, %p377_p11 }
  0x21   :  { %387 = shalt.err (!%p384_p1)
}
  0x22   :  { %22 = dma.hbm_to_vmem [thread:$0]  %s526_s0, 128, %s468_s15, [#allocation3], %s440_s24, %s440_s24, %s441_s25  }
  0x23   :  { %s442_s10 = smov [#allocation7]   ;;  %s388_s14 = scalar_lea.hbm %s528_s2, 128 }
  0x24   :  { %s41_s11 = sshll.u32 %s442_s10, 4  ;;  %p389_p2 = scmp.ne.s32.totalorder %s528_s2, %s388_s14  ;;  %s42_s11 = int_to_ptr.vmem [resolvable:$true] %s41_s11 }
  0x25   :  { %p392_p3 = scmp.lt.u32.totalorder %s388_s14, %s528_s2 }
  0x27   :  { %p394_p4 = pnand %p392_p3, %p389_p2 }
  0x29   :  { %397 = shalt.err (!%p394_p4)
}
  0x2a   :  { %s398_s20 = scalar_lea.vmem %s42_s11, 128  ;;  %p403_p6 = scmp.lt.s32.totalorder %s42_s11, %s42_s11 }
  0x2b   :  { %p399_p5 = scmp.ne.s32.totalorder %s42_s11, %s398_s20  ;;  %p404_p7 = scmp.lt.s32.totalorder %s398_s20, %s398_s20 }
  0x2d   :  { %p405_p8 = por %p404_p7, %p403_p6 }
  0x2f   :  { %p406_p9 = pnand %p405_p8, %p399_p5 }
  0x31   :  { %409 = shalt.err (!%p406_p9)
}
  0x32   :  { %44 = dma.hbm_to_vmem [thread:$0]  %s528_s2, 128, %s42_s11, [#allocation6]  }
  0x33   :  { %432 = dma.done.wait [#allocation3], 128  }
  0x34   :  { %433 = vsyncadd [#allocation3], 4294967168 }
  0x35   :  { %434 = dma.done.wait [#allocation6], 512  }
  0x36   :  { %435 = vsyncadd [#allocation6], 4294966784  ;;  %v443_v0 = vmov 0.0   ;;  %vm444_vm0 = vmmov 0   ;;  %v332_v1 = vld [vmem:[#allocation5] sm:$0xff]   ;;  %v333_v2 = vld [vmem:[#allocation2] sm:$0xff]   ;;  %v240_v25 = vlaneseq }
  0x37   :  { %304 = vmatprep.subr.bf16.mxu0 %v443_v0  ;;  %306 = vmatprep.mubr.msk.bf16.mxu0 %vm444_vm0, %v443_v0  ;;  %vm81_vm1 = vcmask 130048   ;;  %v334_v3 = vld [vmem:[#allocation5 + $0x8] sm:$0xff]   ;;  %v288_v4 = vld [vmem:[#allocation7] ss:$0 sm:$0xff]  ;;  %v335_v14 = vld [vmem:[#allocation5 + $0x10] sm:$0xff]   ;;  %s445_s2 = smov [#allocation8]  }
  0x38   :  { %310 = vmatprep.subr.bf16.mxu1 %v443_v0  ;;  %312 = vmatprep.mubr.msk.bf16.mxu1 %vm444_vm0, %v443_v0  ;;  %v292_v15 = vld [vmem:[#allocation7 + $0x1] ss:$0 sm:$0xff]  ;;  %v241_v26 = vand.u32 127, %v240_v25  ;;  %v295_v27 = vld [vmem:[#allocation7 + $0x2] ss:$0 sm:$0xff]  ;;  %s275_s21 = sshll.u32 %s445_s2, 4  ;;  %s276_s21 = int_to_ptr.vmem [resolvable:$true] %s275_s21 }
  0x39   :  { %305 = vmatpush3.bf16.msra.mxu0 %v332_v1  ;;  %311 = vmatpush3.bf16.msra.mxu1 %v334_v3  ;;  %s410_s22 = scalar_lea.vmem %s276_s21, 256  ;;  %p415_p11 = scmp.lt.s32.totalorder %s276_s21, %s276_s21 }
  0x3a   :  { %316 = vmatprep.subr.bf16.mxu0 %v443_v0  ;;  %vm242_vm2 = vcmp.ge.s32.totalorder %v241_v26, 1  ;;  %vm243_vm3 = vcmp.lt.s32.totalorder %v241_v26, 7  ;;  %vm265_vm5 = vcmp.eq.s32.totalorder %v241_v26, 0  ;;  %p411_p10 = scmp.ne.s32.totalorder %s276_s21, %s410_s22  ;;  %p416_p12 = scmp.lt.s32.totalorder %s410_s22, %s410_s22 }
  0x3b   :  { %vm244_vm4 = vmand %vm242_vm2, %vm243_vm3 }
  0x3c   :  { %307 = vmatmul.mubr.msk.bf16.vlgmr.msra.gmra.mrb[0].mxu0 %vm81_vm1, %v333_v2  ;;  %p417_p13 = por %p416_p12, %p415_p11 }
  0x3d   :  { %318 = vmatprep.mubr.msk.bf16.mxu0 %vm444_vm0, %v443_v0  ;;  %317 = vmatpush3.bf16.msra.mxu0 %v335_v14 }
  0x3e   :  { %p418_p0 = pnand %p417_p13, %p411_p10 }
 0x10f   :  { %v119_v5 = vpop.f32.mrb[0].mxu0 }
 0x110   :  { %v120_v6 = vadd.f32 %v288_v4, %v119_v5  ;;  %v308_v7 = vpop.f32.mrb[1].mxu0 }
 0x111   :  { %v122_v8 = vpop.f32.mrb[2].mxu0 }
 0x112   :  { %v123_v9 = vadd.f32 %v288_v4, %v122_v8  ;;  %v309_v10 = vpop.f32.mrb[3].mxu0  ;;  %v126_v11 = vmax.f32 %v120_v6, 0.0 }
 0x114   :  { %v127_v12 = vmax.f32 %v123_v9, 0.0 }
 0x116   :  { %v128_v13 = vpack.c.bf16 %v127_v12, %v126_v11 }
 0x118   :  { %313 = vmatmul.mubr.msk.bf16.vlgmr.msra.gmra.mrb[0].mxu1 %vm81_vm1, %v128_v13 }
 0x1eb   :  { %v176_v16 = vpop.f32.mrb[0].mxu1 }
 0x1ec   :  { %v177_v17 = vadd.f32 %v292_v15, %v176_v16  ;;  %v314_v18 = vpop.f32.mrb[1].mxu1 }
 0x1ed   :  { %v179_v19 = vpop.f32.mrb[2].mxu1 }
 0x1ee   :  { %v180_v20 = vadd.f32 %v292_v15, %v179_v19  ;;  %v315_v21 = vpop.f32.mrb[3].mxu1  ;;  %v183_v22 = vmax.f32 %v177_v17, 0.0 }
 0x1f0   :  { %v184_v23 = vmax.f32 %v180_v20, 0.0 }
 0x1f2   :  { %v185_v24 = vpack.c.bf16 %v184_v23, %v183_v22 }
 0x1f4   :  { %319 = vmatmul.mubr.msk.bf16.vlgmr.msra.gmra.mrb[4].mxu0 %vm81_vm1, %v185_v24 }
 0x2c7   :  { %v233_v28 = vpop.f32.mrb[4].mxu0 }
 0x2c8   :  { %v234_v29 = vadd.f32 %v295_v27, %v233_v28  ;;  %v320_v30 = vpop.f32.mrb[5].mxu0 }
 0x2c9   :  { %v236_v31 = vpop.f32.mrb[6].mxu0 }
 0x2ca   :  { %v237_v32 = vadd.f32 %v295_v27, %v236_v31  ;;  %v321_v33 = vpop.f32.mrb[7].mxu0  ;;  %v245_v34 = vsel %vm244_vm4, %v234_v29, -1e+30 }
 0x2cb   :  { %247 = vmax.xlane.f32.xlu0 %v245_v34 }
 0x2cc   :  { %v246_v35 = vsel %vm244_vm4, %v237_v32, -1e+30 }
 0x2cf   :  { %249 = vmax.xlane.f32.xlu0 %v246_v35 }
 0x358   :  { %v248_v36 = vpop.xlane.xlu0 %247 }
 0x359   :  { %v251_v37 = vsub.f32 %v245_v34, %v248_v36 }
 0x35b   :  { %v253_v38 = vmul.f32 1.442695, %v251_v37 }
 0x35c   :  { %v250_v39 = vpop.xlane.xlu0 %249 }
 0x35d   :  { %336 = vpow2.f32 %v253_v38  ;;  %v252_v40 = vsub.f32 %v246_v35, %v250_v39 }
 0x35f   :  { %v255_v41 = vmul.f32 1.442695, %v252_v40 }
 0x361   :  { %338 = vpow2.f32 %v255_v41 }
 0x367   :  { %v337_v42 = vpop.eup %336 }
 0x368   :  { %257 = vadd.xlane.f32.xlu1 %v337_v42 }
 0x36b   :  { %v339_v43 = vpop.eup %338 }
 0x36c   :  { %259 = vadd.xlane.f32.xlu1 %v339_v43 }
 0x3f5   :  { %v258_v44 = vpop.xlane.xlu1 %257 }
 0x3f6   :  { %340 = vrcp.f32 %v258_v44 }
 0x3f9   :  { %v260_v45 = vpop.xlane.xlu1 %259 }
 0x3fa   :  { %342 = vrcp.f32 %v260_v45 }
 0x400   :  { %v341_v46 = vpop.eup %340 }
 0x401   :  { %v262_v47 = vmul.f32 %v341_v46, %v337_v42 }
 0x403   :  { %v266_v48 = vsel %vm265_vm5, %v234_v29, %v262_v47 }
 0x404   :  { %v343_v49 = vpop.eup %342  ;;  %268 = vst [vmem:[#allocation8] sm:$0xff] %v266_v48 }
 0x405   :  { %v264_v50 = vmul.f32 %v343_v49, %v339_v43 }
 0x407   :  { %v267_v51 = vsel %vm265_vm5, %v237_v32, %v264_v50 }
 0x408   :  { %269 = vst [vmem:[#allocation8 + $0x8] sm:$0xff] %v267_v51 }
 0x409   :  { %421 = shalt.err (!%p418_p0)
}
 0x40a   :  { %s422_s25 = scalar_lea.hbm %s529_s3, 256 }
 0x40b   :  { %p423_p1 = scmp.ne.s32.totalorder %s529_s3, %s422_s25  ;;  %p426_p2 = scmp.lt.u32.totalorder %s422_s25, %s529_s3 }
 0x40d   :  { %p428_p3 = pnand %p426_p2, %p423_p1 }
 0x40f   :  { %431 = shalt.err (!%p428_p3)
}
 0x410   :  { %s446_s30 = smov 128   ;;  %s447_s4 = smov 8  }
 0x411   :  { %281 = dma.vmem_to_hbm [thread:$0]  %s276_s21, 256, %s529_s3, [#allocation4], %s446_s30, %s446_s30, %s447_s4  }
 0x412   :  { %436 = dma.done.wait [#allocation4], 256  }
 0x413   :  { %437 = vsyncadd [#allocation4], 4294967040 }
 0x414   :  { %285 = vsyncpa [#allocation3], 1 }
 0x415   :  { %286 = vsyncpa [#allocation6], 1 }
 0x416   :  { %287 = vsyncpa [#allocation4], 1 }

</bundles_post_ra>
